<compile_context>
chip_gen: v6e
topology: v6e:2x2x1
jax: 0.10.0
libtpu: 0.0.40
codegen_flags: <defaults>
</compile_context>

<pallas_src>
from functools import partial

import jax
import jax.numpy as jnp
from jax.experimental import pallas as pl
from jax.experimental.pallas import tpu as pltpu


def _round_up(a, b):
    return -(-a // b) * b


def fcn_kernel(batch_ref, x_ref, ef_ref,
               w1x_ref, w1e_ref, b1_ref,
               w2_ref, b2_ref,
               w3_ref, b3_ref,
               w4_ref, b4_ref,
               w5_ref, b5_ref,
               out_ref, pooled_acc, iota_scratch,
               *, pool_dtype, n_nodes, needs_mask):
    pid = pl.program_id(0)
    n_tiles = pl.num_programs(0)

    B_pad = pooled_acc.shape[0]
    TN = x_ref.shape[0]

    # --- first node tile: zero the accumulator, build the reusable graph-index iota ---
    @pl.when(pid == 0)
    def _():
        pooled_acc[...] = jnp.zeros_like(pooled_acc)
        iota_scratch[...] = jax.lax.broadcasted_iota(jnp.int32, (B_pad, TN), 0)

    # --- global_add_pool: per-tile segment-sum via one-hot [B_pad, TN] @ x_tile [TN, D] ---
    # One-hot is exact in bf16/f32; padded ids (== B_pad) match no row -> zero column.
    seg_ids = batch_ref[...]                                   # [1, TN] int32
    onehot = (iota_scratch[...] == seg_ids).astype(pool_dtype)  # [B_pad, TN]

    x_tile = x_ref[...]                                        # [TN, D] pool_dtype
    if needs_mask:
        # Ragged last tile of the unpadded x: rows past N are undefined (may be NaN/Inf),
        # so select them to zero (0 * NaN would be NaN through the matmul otherwise).
        row = jax.lax.broadcasted_iota(jnp.int32, (TN, 1), 0)
        valid = (pid * TN + row) < n_nodes
        x_tile = jnp.where(valid, x_tile, jnp.zeros_like(x_tile))

    pooled_acc[...] += jnp.dot(onehot, x_tile, preferred_element_type=jnp.float32)

    # --- MLP only on the last node tile (output block is resident, written back once) ---
    @pl.when(pid == n_tiles - 1)
    def _():
        pooled = pooled_acc[...]                               # [B_pad, input_dim] f32

        # Linear 1 on concat([pooled, eFeature]) split into two matmuls + ReLU
        h = (jnp.dot(pooled, w1x_ref[...], preferred_element_type=jnp.float32)
             + jnp.dot(ef_ref[...], w1e_ref[...], preferred_element_type=jnp.float32)
             + b1_ref[...])
        h = jnp.maximum(h, 0.0)

        # Linear 2..4 + ReLU
        h = jnp.maximum(jnp.dot(h, w2_ref[...], preferred_element_type=jnp.float32) + b2_ref[...], 0.0)
        h = jnp.maximum(jnp.dot(h, w3_ref[...], preferred_element_type=jnp.float32) + b3_ref[...], 0.0)
        h = jnp.maximum(jnp.dot(h, w4_ref[...], preferred_element_type=jnp.float32) + b4_ref[...], 0.0)

        # final Linear (no activation); out_dim is zero-padded to 128 lanes (lane-dense store)
        out_ref[...] = jnp.dot(h, w5_ref[...], preferred_element_type=jnp.float32) + b5_ref[...]


def _choose_node_tile(node_tile, n_nodes, input_dim, B_pad, itemsize, budget_bytes):
    """Largest lane-aligned node tile that fits the VMEM budget (x is double-buffered and
    lane-padded to 128, so its buffer is TN * 128 * itemsize regardless of input_dim<=128)."""
    tn_cap = _round_up(max(n_nodes, 128), 128)           # no point tiling past N
    tn = min(_round_up(node_tile, 128), tn_cap)
    per_row = (2 * _round_up(input_dim, 128) * itemsize   # x, double-buffered, lane-padded
               + 2 * 8 * 4                                # ids (1,TN) sublane-padded, double-buffered
               + _round_up(B_pad, 8) * 4                  # iota scratch
               + 2 * _round_up(B_pad, 8) * max(itemsize, 4))  # one-hot / compare temporaries
    fixed = 4 * 1024 * 1024                               # weights, accumulators, headroom
    tn_max = max(128, ((budget_bytes - fixed) // per_row) // 128 * 128)
    return min(tn, tn_max)


def fcn_forward(x, batch_ids, e_feature, params, *,
                node_tile=16384, use_bf16_pooling=True,
                vmem_budget_bytes=40 * 1024 * 1024):
    """x: [N, input_dim], batch_ids: [N] int graph ids in [0, B), e_feature: [B, ex_dim] f32.

    Pass x already in bf16 (the default pooling dtype) to avoid the one-time wrapper cast.
    """
    N, input_dim = x.shape
    B, ex_dim = e_feature.shape
    hidden = params["w2"].shape[0]
    out_dim = params["w5"].shape[1]

    pool_dtype = jnp.bfloat16 if use_bf16_pooling else jnp.float32
    itemsize = jnp.dtype(pool_dtype).itemsize

    # Lane/sublane-dense padding for the tiny MLP + final store.
    B_pad = _round_up(max(B, 8), 8)
    out_pad = _round_up(max(out_dim, 128), 128)

    # Node tile: multiple of 128 (lane constraint for the [1, TN] id row; also covers the
    # x-tile sublane constraint), sized to the VMEM budget.  x itself is NOT padded/copied:
    # the ragged last tile is masked inside the kernel.
    TN = _choose_node_tile(node_tile, N, input_dim, B_pad, itemsize, vmem_budget_bytes)
    num_tiles = pl.cdiv(N, TN)
    needs_mask = (N % TN) != 0

    # x: cast only (no pad, no copy if already in pool_dtype).
    x_in = x if x.dtype == pool_dtype else x.astype(pool_dtype)
    # ids: pad to a whole number of tiles with an out-of-range graph id (cheap: N*4 bytes).
    ids_p = jnp.pad(batch_ids.astype(jnp.int32), (0, num_tiles * TN - N),
                    constant_values=B_pad).reshape(1, num_tiles * TN)
    ef_p = jnp.pad(e_feature.astype(jnp.float32), ((0, B_pad - B), (0, 0)))
    w5_p = jnp.pad(params["w5"], ((0, 0), (0, out_pad - out_dim)))
    b5_p = jnp.pad(params["b5"], ((0, 0), (0, out_pad - out_dim)))

    args = (ids_p, x_in, ef_p,
            params["w1x"], params["w1e"], params["b1"],
            params["w2"], params["b2"],
            params["w3"], params["b3"],
            params["w4"], params["b4"],
            w5_p, b5_p)

    def const_spec(a):  # DMA'd once; revisited across the node grid
        return pl.BlockSpec(a.shape, lambda n: tuple(0 for _ in a.shape))

    in_specs = [
        pl.BlockSpec((1, TN), lambda n: (0, n)),           # batch ids, tiled on nodes
        pl.BlockSpec((TN, input_dim), lambda n: (n, 0)),   # x, tiled on nodes (ragged tail masked)
    ] + [const_spec(a) for a in args[2:]]                  # eFeature + all weights/biases

    out_specs = pl.BlockSpec((B_pad, out_pad), lambda n: (0, 0))

    # Truthful (memory-bound) cost model: x is read exactly once in pool_dtype.
    pool_flops = 2 * B_pad * N * input_dim
    mlp_flops = 2 * B_pad * ((input_dim + ex_dim) * hidden + hidden * 2 * hidden
                             + 2 * hidden * 2 * hidden + 2 * hidden * hidden
                             + hidden * out_pad)
    bytes_accessed = (N * input_dim * itemsize + ids_p.size * 4
                      + sum(a.size * a.dtype.itemsize for a in args[2:])
                      + B_pad * out_pad * 4)
    cost = pl.CostEstimate(flops=pool_flops + mlp_flops, transcendentals=0,
                           bytes_accessed=bytes_accessed)

    out = pl.pallas_call(
        partial(fcn_kernel, pool_dtype=pool_dtype, n_nodes=N, needs_mask=needs_mask),
        out_shape=jax.ShapeDtypeStruct((B_pad, out_pad), jnp.float32),
        grid=(num_tiles,),
        in_specs=in_specs,
        out_specs=out_specs,
        scratch_shapes=[pltpu.VMEM((B_pad, input_dim), jnp.float32),   # pooled accumulator
                        pltpu.VMEM((B_pad, TN), jnp.int32)],           # hoisted graph-index iota
        compiler_params=pltpu.CompilerParams(
            dimension_semantics=("arbitrary",),            # node axis is a reduction
            vmem_limit_bytes=48 * 1024 * 1024),            # < 64 MiB physical on v7x
        cost_estimate=cost,
    )(*args)

    return out[:B, :out_dim]


def init_params(key, input_dim, ex_dim, hidden_dim, out_dim):
    """Deterministic synthetic weights; layouts are [in, out] (transposed vs torch)."""
    ks = jax.random.split(key, 10)
    s = 0.1
    w1 = jax.random.normal(ks[0], (input_dim + ex_dim, hidden_dim), jnp.float32) * s
    return {
        "w1x": w1[:input_dim],                                                       # [input_dim, H]
        "w1e": w1[input_dim:],                                                       # [ex_dim,   H]
        "b1": jax.random.normal(ks[1], (1, hidden_dim), jnp.float32) * s,
        "w2": jax.random.normal(ks[2], (hidden_dim, hidden_dim * 2), jnp.float32) * s,
        "b2": jax.random.normal(ks[3], (1, hidden_dim * 2), jnp.float32) * s,
        "w3": jax.random.normal(ks[4], (hidden_dim * 2, hidden_dim * 2), jnp.float32) * s,
        "b3": jax.random.normal(ks[5], (1, hidden_dim * 2), jnp.float32) * s,
        "w4": jax.random.normal(ks[6], (hidden_dim * 2, hidden_dim), jnp.float32) * s,
        "b4": jax.random.normal(ks[7], (1, hidden_dim), jnp.float32) * s,
        "w5": jax.random.normal(ks[8], (hidden_dim, out_dim), jnp.float32) * s,
        "b5": jax.random.normal(ks[9], (1, out_dim), jnp.float32) * s,
    }


def fcn_reference(x, batch_ids, e_feature, params, num_graphs):
    """Pure-JAX reference of the torch forward for correctness checking."""
    pooled = jax.ops.segment_sum(x, batch_ids, num_segments=num_graphs)
    hg = jnp.concatenate([pooled, e_feature], axis=1)
    w1 = jnp.concatenate([params["w1x"], params["w1e"]], axis=0)
    h = jnp.maximum(hg @ w1 + params["b1"], 0.0)
    h = jnp.maximum(h @ params["w2"] + params["b2"], 0.0)
    h = jnp.maximum(h @ params["w3"] + params["b3"], 0.0)
    h = jnp.maximum(h @ params["w4"] + params["b4"], 0.0)
    return h @ params["w5"] + params["b5"]


if __name__ == "__main__":
    # Small, forward-consistent shapes; enough nodes to exercise ragged tiles + accumulation.
    input_dim, ex_dim, hidden_dim, out_dim = 16, 8, 32, 4
    num_graphs = 4           # B
    nodes_per_graph = 80
    n_nodes = num_graphs * nodes_per_graph   # 320 (not a multiple of 128 -> ragged tail)

    key = jax.random.PRNGKey(0)
    k_x, k_e, k_p = jax.random.split(key, 3)

    x = jax.random.normal(k_x, (n_nodes, input_dim), jnp.float32)
    e_feature = jax.random.normal(k_e, (num_graphs, ex_dim), jnp.float32)
    batch_ids = jnp.repeat(jnp.arange(num_graphs, dtype=jnp.int32), nodes_per_graph)

    params = init_params(k_p, input_dim, ex_dim, hidden_dim, out_dim)
    ref = fcn_reference(x, batch_ids, e_feature, params, num_graphs)

    # Default path: bf16 pooling, large tile (clamped to one ragged tile at this size).
    out = fcn_forward(x, batch_ids, e_feature, params)
    out = jax.block_until_ready(out)
    assert out.shape == (num_graphs, out_dim)
    assert jnp.allclose(out, ref, atol=2e-2, rtol=2e-2), "default bf16 path mismatch vs reference"

    # Exact f32 path, small node tile to force multi-tile accumulation + masked ragged tail.
    out_f32 = fcn_forward(x, batch_ids, e_feature, params, node_tile=128,
                          use_bf16_pooling=False)
    out_f32 = jax.block_until_ready(out_f32)
    assert jnp.allclose(out_f32, ref, atol=1e-4, rtol=1e-4), "f32 path mismatch vs reference"

    # bf16 pooling with multiple tiles (exercises accumulator + mask together).
    out_bf16 = fcn_forward(x, batch_ids, e_feature, params, node_tile=128,
                           use_bf16_pooling=True)
    out_bf16 = jax.block_until_ready(out_bf16)
    assert jnp.allclose(out_bf16, ref, atol=2e-2, rtol=2e-2), "bf16 multi-tile path mismatch"

    print("KERNEL_OK")
</pallas_src>

<mosaic_0001>
module attributes {stable_mosaic.version = 11 : i64} {
  func.func @fcn_kernel(%arg0: i32, %arg1: memref<1x384xi32, #tpu.memory_space<vmem>>, %arg2: memref<384x16xbf16, #tpu.memory_space<vmem>>, %arg3: memref<8x8xf32, #tpu.memory_space<vmem>>, %arg4: memref<16x32xf32, #tpu.memory_space<vmem>>, %arg5: memref<8x32xf32, #tpu.memory_space<vmem>>, %arg6: memref<1x32xf32, #tpu.memory_space<vmem>>, %arg7: memref<32x64xf32, #tpu.memory_space<vmem>>, %arg8: memref<1x64xf32, #tpu.memory_space<vmem>>, %arg9: memref<64x64xf32, #tpu.memory_space<vmem>>, %arg10: memref<1x64xf32, #tpu.memory_space<vmem>>, %arg11: memref<64x32xf32, #tpu.memory_space<vmem>>, %arg12: memref<1x32xf32, #tpu.memory_space<vmem>>, %arg13: memref<32x128xf32, #tpu.memory_space<vmem>>, %arg14: memref<1x128xf32, #tpu.memory_space<vmem>>, %arg15: memref<8x128xf32, #tpu.memory_space<vmem>>, %arg16: memref<8x16xf32, #tpu.memory_space<vmem>>, %arg17: memref<8x384xi32, #tpu.memory_space<vmem>>) attributes {dimension_semantics = [#tpu.dimension_semantics<arbitrary>], iteration_bounds = array<i64: 1>, scalar_prefetch = 0 : i64, scratch_operands = 2 : i64, tpu.core_type = #tpu.core_type<tc>, window_params = [{transform_indices = @transform_0, window_bounds = array<i64: 1, 384>}, {transform_indices = @transform_1, window_bounds = array<i64: 384, 16>}, {pipeline_mode = #tpu.pipeline_mode<synchronous>, transform_indices = @transform_2, window_bounds = array<i64: 8, 8>}, {pipeline_mode = #tpu.pipeline_mode<synchronous>, transform_indices = @transform_3, window_bounds = array<i64: 16, 32>}, {pipeline_mode = #tpu.pipeline_mode<synchronous>, transform_indices = @transform_4, window_bounds = array<i64: 8, 32>}, {pipeline_mode = #tpu.pipeline_mode<synchronous>, transform_indices = @transform_5, window_bounds = array<i64: 1, 32>}, {pipeline_mode = #tpu.pipeline_mode<synchronous>, transform_indices = @transform_6, window_bounds = array<i64: 32, 64>}, {pipeline_mode = #tpu.pipeline_mode<synchronous>, transform_indices = @transform_7, window_bounds = array<i64: 1, 64>}, {pipeline_mode = #tpu.pipeline_mode<synchronous>, transform_indices = @transform_8, window_bounds = array<i64: 64, 64>}, {pipeline_mode = #tpu.pipeline_mode<synchronous>, transform_indices = @transform_9, window_bounds = array<i64: 1, 64>}, {pipeline_mode = #tpu.pipeline_mode<synchronous>, transform_indices = @transform_10, window_bounds = array<i64: 64, 32>}, {pipeline_mode = #tpu.pipeline_mode<synchronous>, transform_indices = @transform_11, window_bounds = array<i64: 1, 32>}, {pipeline_mode = #tpu.pipeline_mode<synchronous>, transform_indices = @transform_12, window_bounds = array<i64: 32, 128>}, {pipeline_mode = #tpu.pipeline_mode<synchronous>, transform_indices = @transform_13, window_bounds = array<i64: 1, 128>}, {pipeline_mode = #tpu.pipeline_mode<synchronous>, transform_indices = @transform_14, window_bounds = array<i64: 8, 128>}]} {
    %c0_i32 = arith.constant 0 : i32
    %0 = arith.cmpi eq, %arg0, %c0_i32 : i32
    %1 = arith.extui %0 : i1 to i32
    %c0_i32_0 = arith.constant 0 : i32
    %2 = arith.cmpi ne, %1, %c0_i32_0 : i32
    scf.if %2 {
      %cst_13 = arith.constant 0.000000e+00 : f32
      %28 = vector.broadcast %cst_13 : f32 to vector<8x16xf32>
      %c0_14 = arith.constant 0 : index
      %c0_15 = arith.constant 0 : index
      %29 = vector.load %arg16[%c0_14, %c0_15] : memref<8x16xf32, #tpu.memory_space<vmem>>, vector<8x16xf32>
      tpu.vector_store %arg16[%c0_14, %c0_15], %28 {strides = array<i32>} : memref<8x16xf32, #tpu.memory_space<vmem>>, vector<8x16xf32>,
      %30 = tpu.iota {dimensions = array<i32: 0>} : vector<8x384xi32>
      %c0_16 = arith.constant 0 : index
      %c0_17 = arith.constant 0 : index
      %31 = vector.load %arg17[%c0_16, %c0_17] : memref<8x384xi32, #tpu.memory_space<vmem>>, vector<8x384xi32>
      tpu.vector_store %arg17[%c0_16, %c0_17], %30 {strides = array<i32>} : memref<8x384xi32, #tpu.memory_space<vmem>>, vector<8x384xi32>,
    } else {
    }
    %c0 = arith.constant 0 : index
    %c0_1 = arith.constant 0 : index
    %3 = vector.load %arg1[%c0, %c0_1] : memref<1x384xi32, #tpu.memory_space<vmem>>, vector<1x384xi32>
    %c0_2 = arith.constant 0 : index
    %c0_3 = arith.constant 0 : index
    %4 = vector.load %arg17[%c0_2, %c0_3] : memref<8x384xi32, #tpu.memory_space<vmem>>, vector<8x384xi32>
    %5 = vector.broadcast %3 : vector<1x384xi32> to vector<8x384xi32>
    %6 = arith.cmpi eq, %4, %5 : vector<8x384xi32>
    %7 = arith.extui %6 : vector<8x384xi1> to vector<8x384xi32>
    %8 = arith.sitofp %7 : vector<8x384xi32> to vector<8x384xf32>
    %9 = arith.truncf %8 : vector<8x384xf32> to vector<8x384xbf16>
    %c0_4 = arith.constant 0 : index
    %c0_5 = arith.constant 0 : index
    %10 = vector.load %arg2[%c0_4, %c0_5] : memref<384x16xbf16, #tpu.memory_space<vmem>>, vector<384x16xbf16>
    %11 = tpu.iota {dimensions = array<i32: 0>} : vector<384x1xi32>
    %c384_i32 = arith.constant 384 : i32
    %12 = arith.muli %arg0, %c384_i32 : i32
    %13 = vector.broadcast %12 : i32 to vector<384x1xi32>
    %14 = arith.addi %13, %11 : vector<384x1xi32>
    %c320_i32 = arith.constant 320 : i32
    %15 = vector.broadcast %c320_i32 : i32 to vector<384x1xi32>
    %16 = arith.cmpi slt, %14, %15 : vector<384x1xi32>
    %cst = arith.constant 0.000000e+00 : bf16
    %17 = vector.broadcast %cst : bf16 to vector<384x16xbf16>
    %18 = vector.shape_cast %16 : vector<384x1xi1> to vector<384x1xi1>
    %19 = vector.broadcast %18 : vector<384x1xi1> to vector<384x16xi1>
    %20 = arith.select %19, %10, %17 : vector<384x16xi1>, vector<384x16xbf16>
    %c0_6 = arith.constant 0 : index
    %c0_7 = arith.constant 0 : index
    %21 = vector.load %arg16[%c0_6, %c0_7] : memref<8x16xf32, #tpu.memory_space<vmem>>, vector<8x16xf32>
    %cst_8 = arith.constant dense<0.000000e+00> : vector<8x16xf32>
    %22 = tpu.matmul %9, %20, %cst_8 {dimension_numbers = #tpu.dot_dimension_numbers<[1], [0], [0], [1], [0, 0, 1, 1], [], []>} : vector<8x384xbf16>, vector<384x16xbf16>, vector<8x16xf32> -> vector<8x16xf32>
    %23 = arith.addf %21, %22 : vector<8x16xf32>
    %c0_9 = arith.constant 0 : index
    %c0_10 = arith.constant 0 : index
    %24 = vector.load %arg16[%c0_9, %c0_10] : memref<8x16xf32, #tpu.memory_space<vmem>>, vector<8x16xf32>
    tpu.vector_store %arg16[%c0_9, %c0_10], %23 {strides = array<i32>} : memref<8x16xf32, #tpu.memory_space<vmem>>, vector<8x16xf32>,
    %c0_i32_11 = arith.constant 0 : i32
    %25 = arith.cmpi eq, %arg0, %c0_i32_11 : i32
    %26 = arith.extui %25 : i1 to i32
    %c0_i32_12 = arith.constant 0 : i32
    %27 = arith.cmpi ne, %26, %c0_i32_12 : i32
    scf.if %27 {
      %c0_13 = arith.constant 0 : index
      %c0_14 = arith.constant 0 : index
      %28 = vector.load %arg16[%c0_13, %c0_14] : memref<8x16xf32, #tpu.memory_space<vmem>>, vector<8x16xf32>
      %c0_15 = arith.constant 0 : index
      %c0_16 = arith.constant 0 : index
      %29 = vector.load %arg4[%c0_15, %c0_16] : memref<16x32xf32, #tpu.memory_space<vmem>>, vector<16x32xf32>
      %cst_17 = arith.constant dense<0.000000e+00> : vector<8x32xf32>
      %30 = tpu.matmul %28, %29, %cst_17 {dimension_numbers = #tpu.dot_dimension_numbers<[1], [0], [0], [1], [0, 0, 1, 1], [], []>} : vector<8x16xf32>, vector<16x32xf32>, vector<8x32xf32> -> vector<8x32xf32>
      %c0_18 = arith.constant 0 : index
      %c0_19 = arith.constant 0 : index
      %31 = vector.load %arg3[%c0_18, %c0_19] : memref<8x8xf32, #tpu.memory_space<vmem>>, vector<8x8xf32>
      %c0_20 = arith.constant 0 : index
      %c0_21 = arith.constant 0 : index
      %32 = vector.load %arg5[%c0_20, %c0_21] : memref<8x32xf32, #tpu.memory_space<vmem>>, vector<8x32xf32>
      %cst_22 = arith.constant dense<0.000000e+00> : vector<8x32xf32>
      %33 = tpu.matmul %31, %32, %cst_22 {dimension_numbers = #tpu.dot_dimension_numbers<[1], [0], [0], [1], [0, 0, 1, 1], [], []>} : vector<8x8xf32>, vector<8x32xf32>, vector<8x32xf32> -> vector<8x32xf32>
      %34 = arith.addf %30, %33 : vector<8x32xf32>
      %c0_23 = arith.constant 0 : index
      %c0_24 = arith.constant 0 : index
      %35 = vector.load %arg6[%c0_23, %c0_24] : memref<1x32xf32, #tpu.memory_space<vmem>>, vector<1x32xf32>
      %36 = vector.broadcast %35 : vector<1x32xf32> to vector<8x32xf32>
      %37 = arith.addf %34, %36 : vector<8x32xf32>
      %cst_25 = arith.constant 0.000000e+00 : f32
      %38 = vector.broadcast %cst_25 : f32 to vector<8x32xf32>
      %39 = arith.maximumf %37, %38 : vector<8x32xf32>
      %c0_26 = arith.constant 0 : index
      %c0_27 = arith.constant 0 : index
      %40 = vector.load %arg7[%c0_26, %c0_27] : memref<32x64xf32, #tpu.memory_space<vmem>>, vector<32x64xf32>
      %cst_28 = arith.constant dense<0.000000e+00> : vector<8x64xf32>
      %41 = tpu.matmul %39, %40, %cst_28 {dimension_numbers = #tpu.dot_dimension_numbers<[1], [0], [0], [1], [0, 0, 1, 1], [], []>} : vector<8x32xf32>, vector<32x64xf32>, vector<8x64xf32> -> vector<8x64xf32>
      %c0_29 = arith.constant 0 : index
      %c0_30 = arith.constant 0 : index
      %42 = vector.load %arg8[%c0_29, %c0_30] : memref<1x64xf32, #tpu.memory_space<vmem>>, vector<1x64xf32>
      %43 = vector.broadcast %42 : vector<1x64xf32> to vector<8x64xf32>
      %44 = arith.addf %41, %43 : vector<8x64xf32>
      %cst_31 = arith.constant 0.000000e+00 : f32
      %45 = vector.broadcast %cst_31 : f32 to vector<8x64xf32>
      %46 = arith.maximumf %44, %45 : vector<8x64xf32>
      %c0_32 = arith.constant 0 : index
      %c0_33 = arith.constant 0 : index
      %47 = vector.load %arg9[%c0_32, %c0_33] : memref<64x64xf32, #tpu.memory_space<vmem>>, vector<64x64xf32>
      %cst_34 = arith.constant dense<0.000000e+00> : vector<8x64xf32>
      %48 = tpu.matmul %46, %47, %cst_34 {dimension_numbers = #tpu.dot_dimension_numbers<[1], [0], [0], [1], [0, 0, 1, 1], [], []>} : vector<8x64xf32>, vector<64x64xf32>, vector<8x64xf32> -> vector<8x64xf32>
      %c0_35 = arith.constant 0 : index
      %c0_36 = arith.constant 0 : index
      %49 = vector.load %arg10[%c0_35, %c0_36] : memref<1x64xf32, #tpu.memory_space<vmem>>, vector<1x64xf32>
      %50 = vector.broadcast %49 : vector<1x64xf32> to vector<8x64xf32>
      %51 = arith.addf %48, %50 : vector<8x64xf32>
      %cst_37 = arith.constant 0.000000e+00 : f32
      %52 = vector.broadcast %cst_37 : f32 to vector<8x64xf32>
      %53 = arith.maximumf %51, %52 : vector<8x64xf32>
      %c0_38 = arith.constant 0 : index
      %c0_39 = arith.constant 0 : index
      %54 = vector.load %arg11[%c0_38, %c0_39] : memref<64x32xf32, #tpu.memory_space<vmem>>, vector<64x32xf32>
      %cst_40 = arith.constant dense<0.000000e+00> : vector<8x32xf32>
      %55 = tpu.matmul %53, %54, %cst_40 {dimension_numbers = #tpu.dot_dimension_numbers<[1], [0], [0], [1], [0, 0, 1, 1], [], []>} : vector<8x64xf32>, vector<64x32xf32>, vector<8x32xf32> -> vector<8x32xf32>
      %c0_41 = arith.constant 0 : index
      %c0_42 = arith.constant 0 : index
      %56 = vector.load %arg12[%c0_41, %c0_42] : memref<1x32xf32, #tpu.memory_space<vmem>>, vector<1x32xf32>
      %57 = vector.broadcast %56 : vector<1x32xf32> to vector<8x32xf32>
      %58 = arith.addf %55, %57 : vector<8x32xf32>
      %cst_43 = arith.constant 0.000000e+00 : f32
      %59 = vector.broadcast %cst_43 : f32 to vector<8x32xf32>
      %60 = arith.maximumf %58, %59 : vector<8x32xf32>
      %c0_44 = arith.constant 0 : index
      %c0_45 = arith.constant 0 : index
      %61 = vector.load %arg13[%c0_44, %c0_45] : memref<32x128xf32, #tpu.memory_space<vmem>>, vector<32x128xf32>
      %cst_46 = arith.constant dense<0.000000e+00> : vector<8x128xf32>
      %62 = tpu.matmul %60, %61, %cst_46 {dimension_numbers = #tpu.dot_dimension_numbers<[1], [0], [0], [1], [0, 0, 1, 1], [], []>} : vector<8x32xf32>, vector<32x128xf32>, vector<8x128xf32> -> vector<8x128xf32>
      %c0_47 = arith.constant 0 : index
      %c0_48 = arith.constant 0 : index
      %63 = vector.load %arg14[%c0_47, %c0_48] : memref<1x128xf32, #tpu.memory_space<vmem>>, vector<1x128xf32>
      %64 = vector.broadcast %63 : vector<1x128xf32> to vector<8x128xf32>
      %65 = arith.addf %62, %64 : vector<8x128xf32>
      %c0_49 = arith.constant 0 : index
      %c0_50 = arith.constant 0 : index
      %66 = vector.load %arg15[%c0_49, %c0_50] : memref<8x128xf32, #tpu.memory_space<vmem>>, vector<8x128xf32>
      tpu.vector_store %arg15[%c0_49, %c0_50], %65 {strides = array<i32>} : memref<8x128xf32, #tpu.memory_space<vmem>>, vector<8x128xf32>,
    } else {
    }
    return
  }
  func.func @transform_0(%arg0: i32) -> (i32, i32) {
    %c0_i32 = arith.constant 0 : i32
    %c0_i32_0 = arith.constant 0 : i32
    return %c0_i32, %arg0 : i32, i32
  }
  func.func @transform_1(%arg0: i32) -> (i32, i32) {
    %c0_i32 = arith.constant 0 : i32
    %c0_i32_0 = arith.constant 0 : i32
    return %arg0, %c0_i32 : i32, i32
  }
  func.func @transform_2(%arg0: i32) -> (i32, i32) {
    %c0_i32 = arith.constant 0 : i32
    %c0_i32_0 = arith.constant 0 : i32
    %c0_i32_1 = arith.constant 0 : i32
    return %c0_i32, %c0_i32_0 : i32, i32
  }
  func.func @transform_3(%arg0: i32) -> (i32, i32) {
    %c0_i32 = arith.constant 0 : i32
    %c0_i32_0 = arith.constant 0 : i32
    %c0_i32_1 = arith.constant 0 : i32
    return %c0_i32, %c0_i32_0 : i32, i32
  }
  func.func @transform_4(%arg0: i32) -> (i32, i32) {
    %c0_i32 = arith.constant 0 : i32
    %c0_i32_0 = arith.constant 0 : i32
    %c0_i32_1 = arith.constant 0 : i32
    return %c0_i32, %c0_i32_0 : i32, i32
  }
  func.func @transform_5(%arg0: i32) -> (i32, i32) {
    %c0_i32 = arith.constant 0 : i32
    %c0_i32_0 = arith.constant 0 : i32
    %c0_i32_1 = arith.constant 0 : i32
    return %c0_i32, %c0_i32_0 : i32, i32
  }
  func.func @transform_6(%arg0: i32) -> (i32, i32) {
    %c0_i32 = arith.constant 0 : i32
    %c0_i32_0 = arith.constant 0 : i32
    %c0_i32_1 = arith.constant 0 : i32
    return %c0_i32, %c0_i32_0 : i32, i32
  }
  func.func @transform_7(%arg0: i32) -> (i32, i32) {
    %c0_i32 = arith.constant 0 : i32
    %c0_i32_0 = arith.constant 0 : i32
    %c0_i32_1 = arith.constant 0 : i32
    return %c0_i32, %c0_i32_0 : i32, i32
  }
  func.func @transform_8(%arg0: i32) -> (i32, i32) {
    %c0_i32 = arith.constant 0 : i32
    %c0_i32_0 = arith.constant 0 : i32
    %c0_i32_1 = arith.constant 0 : i32
    return %c0_i32, %c0_i32_0 : i32, i32
  }
  func.func @transform_9(%arg0: i32) -> (i32, i32) {
    %c0_i32 = arith.constant 0 : i32
    %c0_i32_0 = arith.constant 0 : i32
    %c0_i32_1 = arith.constant 0 : i32
    return %c0_i32, %c0_i32_0 : i32, i32
  }
  func.func @transform_10(%arg0: i32) -> (i32, i32) {
    %c0_i32 = arith.constant 0 : i32
    %c0_i32_0 = arith.constant 0 : i32
    %c0_i32_1 = arith.constant 0 : i32
    return %c0_i32, %c0_i32_0 : i32, i32
  }
  func.func @transform_11(%arg0: i32) -> (i32, i32) {
    %c0_i32 = arith.constant 0 : i32
    %c0_i32_0 = arith.constant 0 : i32
    %c0_i32_1 = arith.constant 0 : i32
    return %c0_i32, %c0_i32_0 : i32, i32
  }
  func.func @transform_12(%arg0: i32) -> (i32, i32) {
    %c0_i32 = arith.constant 0 : i32
    %c0_i32_0 = arith.constant 0 : i32
    %c0_i32_1 = arith.constant 0 : i32
    return %c0_i32, %c0_i32_0 : i32, i32
  }
  func.func @transform_13(%arg0: i32) -> (i32, i32) {
    %c0_i32 = arith.constant 0 : i32
    %c0_i32_0 = arith.constant 0 : i32
    %c0_i32_1 = arith.constant 0 : i32
    return %c0_i32, %c0_i32_0 : i32, i32
  }
  func.func @transform_14(%arg0: i32) -> (i32, i32) {
    %c0_i32 = arith.constant 0 : i32
    %c0_i32_0 = arith.constant 0 : i32
    %c0_i32_1 = arith.constant 0 : i32
    return %c0_i32, %c0_i32_0 : i32, i32
  }
}

</mosaic_0001>

<bundles_post_ra>
// kernel: tpu_custom_call.1
= control target key start
LH: loop header
LB: loop body
LE: loop exit
PB: predicated region body
PF: predicated region fallthrough
CT: control target
= control target key end

     0   :  { %v1458_v2 = vmov 0.0   ;;  %vm1459_vm0 = vmmov 1   ;;  %vm1460_vm2 = vmmov 0   ;;  %s1950_s0 = inlined_call_operand.vmem [shape: s32[1,384], index: 0, kind: input, shape index: {}]   ;;  %s1951_s1 = inlined_call_operand.vmem [shape: bf16[320,16], index: 1, kind: input, shape index: {}]   ;;  %s1952_s2 = inlined_call_operand.vmem [shape: f32[8,8], index: 2, kind: input, shape index: {}]   ;;  %s1953_s3 = inlined_call_operand.vmem [shape: f32[16,32], index: 3, kind: input, shape index: {}]   ;;  %s1954_s4 = inlined_call_operand.vmem [shape: f32[8,32], index: 4, kind: input, shape index: {}]   ;;  %s1955_s5 = inlined_call_operand.vmem [shape: f32[1,32], index: 5, kind: input, shape index: {}]   ;;  %s1956_s6 = inlined_call_operand.vmem [shape: f32[32,64], index: 6, kind: input, shape index: {}]   ;;  %s1957_s7 = inlined_call_operand.vmem [shape: f32[1,64], index: 7, kind: input, shape index: {}]   ;;  %s1958_s8 = inlined_call_operand.vmem [shape: f32[64,64], index: 8, kind: input, shape index: {}]   ;;  %s1959_s9 = inlined_call_operand.vmem [shape: f32[1,64], index: 9, kind: input, shape index: {}]   ;;  %s1960_s10 = inlined_call_operand.vmem [shape: f32[64,32], index: 10, kind: input, shape index: {}]   ;;  %s1961_s11 = inlined_call_operand.vmem [shape: f32[1,32], index: 11, kind: input, shape index: {}]   ;;  %s1962_s12 = inlined_call_operand.vmem [shape: f32[32,128], index: 12, kind: input, shape index: {}]   ;;  %s1963_s13 = inlined_call_operand.vmem [shape: f32[1,128], index: 13, kind: input, shape index: {}]   ;;  %s1964_s14 = inlined_call_operand.hbm [shape: f32[8,128], index: 14, kind: output, shape index: {}]  }
   0x1   :  { %v118_v0 = vld [vmem:[%s1951_s1 + $0x78] sm:$0xf]  ;;  %v119_v1 = vld [vmem:[%s1951_s1 + $0x7c] sm:$0xf]  ;;  %1339 = vmatprep.subr.bf16.mxu1 %v1458_v2  ;;  %vm1545_vm1 = vmpackc.low %vm1459_vm0, %vm1459_vm0  ;;  %1355 = vmatprep.mubr.msk.bf16.mxu1 %vm1460_vm2, %v1458_v2 }
   0x2   :  { %v134_v4 = vld [vmem:[%s1951_s1 + $0xb8] sm:$0xf]  ;;  %v135_v5 = vld [vmem:[%s1951_s1 + $0xbc] sm:$0xf]  ;;  %v457_v6 = vsel %vm1545_vm1, %v118_v0, 0  ;;  %v458_v7 = vsel %vm1545_vm1, %v119_v1, 0  ;;  %vm1561_vm3 = vmpackc.low %vm1460_vm2, %vm1460_vm2 }
   0x3   :  { %v102_v9 = vld [vmem:[%s1951_s1 + $0x38] sm:$0xf]  ;;  %v103_v10 = vld [vmem:[%s1951_s1 + $0x3c] sm:$0xf]  ;;  %v1249_v11 = vcombine.low %v457_v6, %v458_v7  ;;  %v473_v12 = vsel %vm1561_vm3, %v134_v4, 0  ;;  %v474_v13 = vsel %vm1561_vm3, %v135_v5, 0 }
   0x4   :  { %v441_v14 = vsel %vm1545_vm1, %v102_v9, 0  ;;  %v116_v15 = vld [vmem:[%s1951_s1 + $0x70] sm:$0xf]  ;;  %v1257_v16 = vcombine.low %v473_v12, %v474_v13  ;;  %v442_v17 = vsel %vm1545_vm1, %v103_v10, 0  ;;  %v117_v18 = vld [vmem:[%s1951_s1 + $0x74] sm:$0xf] }
   0x5   :  { %v455_v19 = vsel %vm1545_vm1, %v116_v15, 0  ;;  %v132_v20 = vld [vmem:[%s1951_s1 + $0xb0] sm:$0xf]  ;;  %1275 = vmatprep.subr.bf16.mxu0 %v1249_v11  ;;  %v1241_v21 = vcombine.low %v441_v14, %v442_v17  ;;  %v456_v22 = vsel %vm1545_vm1, %v117_v18, 0  ;;  %v133_v23 = vld [vmem:[%s1951_s1 + $0xb4] sm:$0xf] }
   0x6   :  { %v471_v24 = vsel %vm1561_vm3, %v132_v20, 0  ;;  %v100_v25 = vld [vmem:[%s1951_s1 + $0x30] sm:$0xf]  ;;  %1340 = vmatpush3.bf16.msra.mxu1 %v1257_v16  ;;  %v1248_v26 = vcombine.low %v455_v19, %v456_v22  ;;  %v472_v27 = vsel %vm1561_vm3, %v133_v23, 0  ;;  %v101_v28 = vld [vmem:[%s1951_s1 + $0x34] sm:$0xf] }
   0x7   :  { %v439_v29 = vsel %vm1545_vm1, %v100_v25, 0  ;;  %v114_v30 = vld [vmem:[%s1951_s1 + $0x68] sm:$0xf]  ;;  %1276 = vmatpush3.bf16.msra.mxu0 %v1241_v21  ;;  %1341 = vmatprep.subr.bf16.mxu1 %v1458_v2  ;;  %v1256_v31 = vcombine.low %v471_v24, %v472_v27  ;;  %v440_v32 = vsel %vm1545_vm1, %v101_v28, 0  ;;  %v115_v33 = vld [vmem:[%s1951_s1 + $0x6c] sm:$0xf] }
   0x8   :  { %v453_v34 = vsel %vm1545_vm1, %v114_v30, 0  ;;  %v130_v35 = vld [vmem:[%s1951_s1 + $0xa8] sm:$0xf]  ;;  %1277 = vmatprep.subr.bf16.mxu0 %v1248_v26  ;;  %v1240_v36 = vcombine.low %v439_v29, %v440_v32  ;;  %v454_v37 = vsel %vm1545_vm1, %v115_v33, 0  ;;  %v131_v38 = vld [vmem:[%s1951_s1 + $0xac] sm:$0xf] }
   0x9   :  { %v469_v39 = vsel %vm1561_vm3, %v130_v35, 0  ;;  %v98_v40 = vld [vmem:[%s1951_s1 + $0x28] sm:$0xf]  ;;  %v1247_v41 = vcombine.low %v453_v34, %v454_v37  ;;  %v470_v42 = vsel %vm1561_vm3, %v131_v38, 0  ;;  %v99_v43 = vld [vmem:[%s1951_s1 + $0x2c] sm:$0xf]  ;;  %v55_v34 = vlaneseq }
   0xa   :  { %v437_v44 = vsel %vm1545_vm1, %v98_v40, 0  ;;  %v112_v45 = vld [vmem:[%s1951_s1 + $0x60] sm:$0xf]  ;;  %1342 = vmatpush3.bf16.msra.mxu1 %v1256_v31  ;;  %v1255_v46 = vcombine.low %v469_v39, %v470_v42  ;;  %v438_v47 = vsel %vm1545_vm1, %v99_v43, 0  ;;  %v113_v48 = vld [vmem:[%s1951_s1 + $0x64] sm:$0xf] }
   0xb   :  { %v451_v49 = vsel %vm1545_vm1, %v112_v45, 0  ;;  %v128_v50 = vld [vmem:[%s1951_s1 + $0xa0] sm:$0xf]  ;;  %1278 = vmatpush3.bf16.msra.mxu0 %v1240_v36  ;;  %1343 = vmatprep.subr.bf16.mxu1 %v1458_v2  ;;  %v1239_v51 = vcombine.low %v437_v44, %v438_v47  ;;  %v452_v52 = vsel %vm1545_vm1, %v113_v48, 0  ;;  %v129_v53 = vld [vmem:[%s1951_s1 + $0xa4] sm:$0xf] }
   0xc   :  { %v467_v54 = vsel %vm1561_vm3, %v128_v50, 0  ;;  %v96_v55 = vld [vmem:[%s1951_s1 + $0x20] sm:$0xf]  ;;  %1279 = vmatprep.subr.bf16.mxu0 %v1247_v41  ;;  %v1246_v56 = vcombine.low %v451_v49, %v452_v52  ;;  %v468_v57 = vsel %vm1561_vm3, %v129_v53, 0  ;;  %v97_v58 = vld [vmem:[%s1951_s1 + $0x24] sm:$0xf] }
   0xd   :  { %v435_v59 = vsel %vm1545_vm1, %v96_v55, 0  ;;  %v110_v60 = vld [vmem:[%s1951_s1 + $0x58] sm:$0xf]  ;;  %v436_v61 = vsel %vm1545_vm1, %v97_v58, 0  ;;  %v111_v62 = vld [vmem:[%s1951_s1 + $0x5c] sm:$0xf]  ;;  %v1254_v1 = vcombine.low %v467_v54, %v468_v57 }
   0xe   :  { %v449_v63 = vsel %vm1545_vm1, %v110_v60, 0  ;;  %v126_v0 = vld [vmem:[%s1951_s1 + $0x98] sm:$0xf]  ;;  %1344 = vmatpush3.bf16.msra.mxu1 %v1255_v46  ;;  %v450_v4 = vsel %vm1545_vm1, %v111_v62, 0  ;;  %v127_v5 = vld [vmem:[%s1951_s1 + $0x9c] sm:$0xf]  ;;  %v1238_v7 = vcombine.low %v435_v59, %v436_v61 }
   0xf   :  { %v94_v6 = vld [vmem:[%s1951_s1 + $0x18] sm:$0xf]  ;;  %1280 = vmatpush3.bf16.msra.mxu0 %v1239_v51  ;;  %1345 = vmatprep.subr.bf16.mxu1 %v1458_v2  ;;  %v465_v8 = vsel %vm1545_vm1, %v126_v0, 0  ;;  %v466_v9 = vsel %vm1545_vm1, %v127_v5, 0  ;;  %v95_v10 = vld [vmem:[%s1951_s1 + $0x1c] sm:$0xf]  ;;  %v1245_v12 = vcombine.low %v449_v63, %v450_v4 }
  0x10   :  { %v108_v11 = vld [vmem:[%s1951_s1 + $0x50] sm:$0xf]  ;;  %1281 = vmatprep.subr.bf16.mxu0 %v1246_v56  ;;  %v433_v13 = vsel %vm1545_vm1, %v94_v6, 0  ;;  %v434_v14 = vsel %vm1545_vm1, %v95_v10, 0  ;;  %v109_v15 = vld [vmem:[%s1951_s1 + $0x54] sm:$0xf]  ;;  %v1253_v21 = vcombine.low %v465_v8, %v466_v9 }
  0x11   :  { %v124_v16 = vld [vmem:[%s1951_s1 + $0x90] sm:$0xf]  ;;  %v447_v17 = vsel %vm1545_vm1, %v108_v11, 0  ;;  %v448_v18 = vsel %vm1545_vm1, %v109_v15, 0  ;;  %v125_v19 = vld [vmem:[%s1951_s1 + $0x94] sm:$0xf]  ;;  %v1237_v24 = vcombine.low %v433_v13, %v434_v14 }
  0x12   :  { %v92_v20 = vld [vmem:[%s1951_s1 + $0x10] sm:$0xf]  ;;  %1346 = vmatpush3.bf16.msra.mxu1 %v1254_v1  ;;  %v93_v22 = vld [vmem:[%s1951_s1 + $0x14] sm:$0xf]  ;;  %v106_v23 = vld [vmem:[%s1951_s1 + $0x48] sm:$0xf]  ;;  %v1244_v29 = vcombine.low %v447_v17, %v448_v18 }
  0x13   :  { %1282 = vmatpush3.bf16.msra.mxu0 %v1238_v7  ;;  %1347 = vmatprep.subr.bf16.mxu1 %v1458_v2  ;;  %v463_v25 = vsel %vm1545_vm1, %v124_v16, 0  ;;  %v464_v26 = vsel %vm1545_vm1, %v125_v19, 0  ;;  %v107_v27 = vld [vmem:[%s1951_s1 + $0x4c] sm:$0xf]  ;;  %v122_v28 = vld [vmem:[%s1951_s1 + $0x88] sm:$0xf] }
  0x14   :  { %1283 = vmatprep.subr.bf16.mxu0 %v1245_v12  ;;  %v431_v30 = vsel %vm1545_vm1, %v92_v20, 0  ;;  %v432_v31 = vsel %vm1545_vm1, %v93_v22, 0  ;;  %v123_v32 = vld [vmem:[%s1951_s1 + $0x8c] sm:$0xf]  ;;  %v90_v33 = vld [vmem:[%s1951_s1 + $0x8] sm:$0xf]  ;;  %v1252_v39 = vcombine.low %v463_v25, %v464_v26 }
  0x15   :  { %v445_v35 = vsel %vm1545_vm1, %v106_v23, 0  ;;  %v446_v36 = vsel %vm1545_vm1, %v107_v27, 0  ;;  %v91_v37 = vld [vmem:[%s1951_s1 + $0xc] sm:$0xf]  ;;  %v104_v38 = vld [vmem:[%s1951_s1 + $0x40] sm:$0xf]  ;;  %v1236_v43 = vcombine.low %v431_v30, %v432_v31 }
  0x16   :  { %1348 = vmatpush3.bf16.msra.mxu1 %v1253_v21  ;;  %v461_v40 = vsel %vm1545_vm1, %v122_v28, 0  ;;  %v462_v41 = vsel %vm1545_vm1, %v123_v32, 0  ;;  %v105_v42 = vld [vmem:[%s1951_s1 + $0x44] sm:$0xf]  ;;  %v429_v44 = vsel %vm1545_vm1, %v90_v33, 0  ;;  %v430_v45 = vsel %vm1545_vm1, %v91_v37, 0 }
  0x17   :  { %1284 = vmatpush3.bf16.msra.mxu0 %v1237_v24  ;;  %1349 = vmatprep.subr.bf16.mxu1 %v1458_v2  ;;  %v443_v46 = vsel %vm1545_vm1, %v104_v38, 0  ;;  %v120_v47 = vld [vmem:[%s1951_s1 + $0x80] sm:$0xf]  ;;  %v1243_v48 = vcombine.low %v445_v35, %v446_v36  ;;  %v444_v49 = vsel %vm1545_vm1, %v105_v42, 0  ;;  %v121_v50 = vld [vmem:[%s1951_s1 + $0x84] sm:$0xf]  ;;  %v1251_v53 = vcombine.low %v461_v40, %v462_v41 }
  0x18   :  { %1285 = vmatprep.subr.bf16.mxu0 %v1244_v29  ;;  %v88_v51 = vld [vmem:[%s1951_s1] sm:$0xf]  ;;  %v56_v52 = vshrl.u32 %v55_v34, 7  ;;  %v89_v54 = vld [vmem:[%s1951_s1 + $0x4] sm:$0xf]  ;;  %v1235_v56 = vcombine.low %v429_v44, %v430_v45 }
  0x19   :  { %v60_v55 = vld [vmem:[%s1950_s0] sm:$0x7] }
  0x1a   :  { %1350 = vmatpush3.bf16.msra.mxu1 %v1252_v39  ;;  %v70_v57 = vsub.s32 1, %v56_v52  ;;  %v74_v58 = vsub.s32 2, %v56_v52  ;;  %v66_v59 = vsub.s32 0, %v56_v52 }
  0x1b   :  { %19 = vsyncpa [#allocation5], 0  ;;  %1286 = vmatpush3.bf16.msra.mxu0 %v1236_v43  ;;  %1351 = vmatprep.subr.bf16.mxu1 %v1458_v2  ;;  %v1242_v60 = vcombine.low %v443_v46, %v444_v49  ;;  %v459_v61 = vsel %vm1545_vm1, %v120_v47, 0  ;;  %v460_v62 = vsel %vm1545_vm1, %v121_v50, 0  ;;  %v427_v63 = vsel %vm1545_vm1, %v88_v51, 0  ;;  %v710_v3 = vld [vmem:[%s1954_s4] sm:$0xff] }
  0x1c   :  { %1287 = vmatprep.subr.bf16.mxu0 %v1243_v48  ;;  %v428_v0 = vsel %vm1545_vm1, %v89_v54, 0  ;;  %v71_v1 = vrot.slane %v60_v55, %v70_v57  ;;  %v75_v4 = vrot.slane %v60_v55, %v74_v58  ;;  %v67_v5 = vrot.slane %v60_v55, %v66_v59  ;;  %v708_v9 = vld [vmem:[%s1953_s3 + $0x8] sm:$0xff]  ;;  %v707_v10 = vld [vmem:[%s1953_s3] sm:$0xff]  ;;  %v870_v27 = vld [vmem:[%s1956_s6 + $0x18] sm:$0xff]  ;;  %s1462_s26 = smov [#allocation4]  }
  0x1d   :  { %v1250_v6 = vcombine.low %v459_v61, %v460_v62  ;;  %v1234_v7 = vcombine.low %v427_v63, %v428_v0  ;;  %v1461_v8 = vmov 1.0|1.0   ;;  %vm53_vm10 = vcmask 130048   ;;  %v709_v11 = vld [vmem:[%s1952_s2] sm:$0xff]  ;;  %v869_v28 = vld [vmem:[%s1956_s6 + $0x10] sm:$0xff]  ;;  %v868_v29 = vld [vmem:[%s1956_s6 + $0x8] sm:$0xff] }
  0x1e   :  { %1352 = vmatpush3.bf16.msra.mxu1 %v1251_v53  ;;  %vm77_vm4 = vcmp.eq.s32.totalorder %v56_v52, %v71_v1  ;;  %vm78_vm6 = vcmp.eq.s32.totalorder %v56_v52, %v75_v4  ;;  %vm76_vm7 = vcmp.eq.s32.totalorder %v56_v52, %v67_v5  ;;  %54 = vst.msk [vmem:[#allocation2] sm:$0xff] %vm53_vm10, %v1458_v2  ;;  %vm711_vm11 = vcmask 64512   ;;  %v867_v30 = vld [vmem:[%s1956_s6] sm:$0xff]  ;;  %v960_v31 = vld [vmem:[%s1958_s8 + $0x38] sm:$0xff]  ;;  %v959_v32 = vld [vmem:[%s1958_s8 + $0x30] sm:$0xff] }
  0x1f   :  { %1288 = vmatpush3.bf16.msra.mxu0 %v1235_v56  ;;  %1353 = vmatprep.subr.bf16.mxu1 %v1458_v2  ;;  %vm1258_vm5 = vmpackc.low %vm77_vm4, %vm77_vm4  ;;  %v958_v33 = vld [vmem:[%s1958_s8 + $0x28] sm:$0xff]  ;;  %v957_v34 = vld [vmem:[%s1958_s8 + $0x20] sm:$0xff]  ;;  %vm878_vm12 = vcmask 261120   ;;  %vm968_vm13 = vcmask 523264  }
  0x20   :  { %1289 = vmatprep.subr.bf16.mxu0 %v1242_v60  ;;  %1259 = vmatprep.mubr.msk.bf16.mxu0 %vm1258_vm5, %v1461_v8  ;;  %vm1262_vm8 = vmpackc.low %vm78_vm6, %vm78_vm6  ;;  %v956_v35 = vld [vmem:[%s1958_s8 + $0x18] sm:$0xff]  ;;  %v1266_v37 = vld [vmem:[%s1955_s5] ss:$0 sm:$0xff] }
  0x21   :  { %vm1260_vm9 = vmpackc.low %vm76_vm7, %vm76_vm7  ;;  %v955_v42 = vld [vmem:[%s1958_s8 + $0x10] sm:$0xff]  ;;  %v954_v43 = vld [vmem:[%s1958_s8 + $0x8] sm:$0xff] }
  0x22   :  { %1354 = vmatpush3.bf16.msra.mxu1 %v1250_v6  ;;  %v953_v44 = vld [vmem:[%s1958_s8] sm:$0xff]  ;;  %v1050_v45 = vld [vmem:[%s1960_s10 + $0x38] sm:$0xff]  ;;  %v1049_v46 = vld [vmem:[%s1960_s10 + $0x30] sm:$0xff]  ;;  %s1223_s8 = sshll.u32 %s1462_s26, 4  ;;  %s1224_s8 = int_to_ptr.vmem [resolvable:$true] %s1223_s8 }
  0x23   :  { %1290 = vmatpush3.bf16.msra.mxu0 %v1234_v7  ;;  %1364 = vmatprep.subr.mxu1 %v1458_v2  ;;  %v1048_v47 = vld [vmem:[%s1960_s10 + $0x28] sm:$0xff]  ;;  %v1047_v48 = vld [vmem:[%s1960_s10 + $0x20] sm:$0xff]  ;;  %v1046_v49 = vld [vmem:[%s1960_s10 + $0x18] sm:$0xff]  ;;  %p1441_p1 = scmp.lt.s32.totalorder %s1224_s8, %s1224_s8 }
  0x24   :  { %1359 = vmatprep.subr.mxu0 %v1458_v2  ;;  %v1267_v50 = vld [vmem:[%s1957_s7] ss:$0 sm:$0xff]  ;;  %v1045_v55 = vld [vmem:[%s1960_s10 + $0x10] sm:$0xff]  ;;  %v1044_v56 = vld [vmem:[%s1960_s10 + $0x8] sm:$0xff] }
  0x25   :  { %1356 = vmatmul.mubr.msk.bf16.vlgmr.msra.gmra.mxu1 %vm1262_vm8, %v1461_v8  ;;  %v475_v18 = vld [vmem:[#allocation2] sm:$0xff]  ;;  %v1135_v58 = vld [vmem:[%s1962_s12 + $0x18] sm:$0xff]  ;;  %v1134_v0 = vld [vmem:[%s1962_s12 + $0x10] sm:$0xff] }
  0x26   :  { %1261 = vmatmul.mubr.msk.bf16.vlgmr.msra.gmra.mxu0 %vm1260_vm9, %v1461_v8  ;;  %1368 = vmatprep.mubr.msk.f32.mxu1 %vm1460_vm2, %v1458_v2  ;;  %v1043_v57 = vld [vmem:[%s1960_s10] sm:$0xff]  ;;  %v1133_v1 = vld [vmem:[%s1962_s12 + $0x8] sm:$0xff] }
  0x27   :  { %1361 = vmatprep.mubr.msk.f32.mxu0 %vm1460_vm2, %v1458_v2  ;;  %1360 = vmatpush3.msra.mxu0 %v710_v3  ;;  %v1269_v59 = vld [vmem:[%s1959_s9] ss:$0 sm:$0xff] }
  0x28   :  { %1365 = vmatpush3.msra.mxu1 %v708_v9  ;;  %1371 = vmatprep.subr.mxu0 %v1458_v2  ;;  %v1132_v4 = vld [vmem:[%s1962_s12] sm:$0xff]  ;;  %s1436_s12 = scalar_lea.vmem %s1224_s8, 128 }
  0x29   :  { %1366 = vmatprep.subr.mxu1 %v1458_v2  ;;  %v1271_v5 = vld [vmem:[%s1961_s11] ss:$0 sm:$0xff]  ;;  %p1437_p0 = scmp.ne.s32.totalorder %s1224_s8, %s1436_s12  ;;  %p1442_p2 = scmp.lt.s32.totalorder %s1436_s12, %s1436_s12 }
  0x2a   :  { %1367 = vmatpush3.msra.mxu1 %v707_v10  ;;  %v1273_v9 = vld [vmem:[%s1963_s13] ss:$0 sm:$0xff] }
  0x2b   :  { %1382 = vmatprep.subr.mxu1 %v1458_v2  ;;  %p1443_p3 = por %p1442_p2, %p1441_p1 }
  0x2d   :  { %p1444_p4 = pnand %p1443_p3, %p1437_p0 }
  0x2e   :  { %1362 = vmatmul.mubr.msk.f32.vlgmr.msra.gmra.mxu0 %vm711_vm11, %v709_v11 }
  0x2f   :  { %1379 = vmatprep.mubr.msk.f32.mxu0 %vm1460_vm2, %v1458_v2  ;;  %1372 = vmatpush3.msra.mxu0 %v870_v27 }
  0x30   :  { %1373 = vmatprep.subr.mxu0 %v1458_v2 }
  0x31   :  { %1374 = vmatpush3.msra.mxu0 %v869_v28 }
  0x32   :  { %1375 = vmatprep.subr.mxu0 %v1458_v2 }
  0x33   :  { %1376 = vmatpush3.msra.mxu0 %v868_v29 }
  0x34   :  { %1377 = vmatprep.subr.mxu0 %v1458_v2 }
  0x35   :  { %1378 = vmatpush3.msra.mxu0 %v867_v30 }
  0x36   :  { %1401 = vmatprep.subr.mxu0 %v1458_v2 }
  0xe5   :  { %v694_v12 = vpop.f32.mrf.mxu1 }
  0xe6   :  { %v1291_v13 = vpop.f32.mrf.mxu0 }
  0xe7   :  { %v1357_v14 = vpop.f32.mrf.mxu1 }
  0xe8   :  { %v1292_v15 = vpop.f32.mrf.mxu0 }
  0xe9   :  { %v1293_v16 = vadd.f32 %v1292_v15, %v1291_v13  ;;  %v697_v17 = vpop.f32.mrf.mxu1 }
  0xea   :  { %v1294_v19 = vpop.f32.mrf.mxu0 }
  0xeb   :  { %v695_v20 = vadd.f32 %v1293_v16, %v694_v12  ;;  %v1358_v21 = vpop.f32.mrf.mxu1 }
  0xec   :  { %v1295_v22 = vpop.f32.mrf.mxu0 }
  0xed   :  { %v700_v23 = vadd.f32 %v695_v20, %v475_v18 }
  0xee   :  { %v781_v25 = vpop.f32.mrf.mxu0 }
  0xef   :  { %702 = vst.msk [vmem:[#allocation2] sm:$0xff] %vm53_vm10, %v700_v23 }
  0xf0   :  { %v1363_v26 = vpop.f32.mrf.mxu0 }
  0xf6   :  { %v706_v24 = vld [vmem:[#allocation2] sm:$0xff] }
  0xf7   :  { %1369 = vmatmul.mubr.msk.f32.vlgmr.msra.gmra.mxu1 %vm53_vm10, %v706_v24 }
  0xf8   :  { %1398 = vmatprep.mubr.msk.f32.mxu1 %vm1460_vm2, %v1458_v2  ;;  %1383 = vmatpush3.msra.mxu1 %v960_v31 }
  0xf9   :  { %1384 = vmatprep.subr.mxu1 %v1458_v2 }
  0xfa   :  { %1385 = vmatpush3.msra.mxu1 %v959_v32 }
  0xfb   :  { %1386 = vmatprep.subr.mxu1 %v1458_v2 }
  0xfc   :  { %1387 = vmatpush3.msra.mxu1 %v958_v33 }
  0xfd   :  { %1388 = vmatprep.subr.mxu1 %v1458_v2 }
  0xfe   :  { %1389 = vmatpush3.msra.mxu1 %v957_v34 }
  0xff   :  { %1390 = vmatprep.subr.mxu1 %v1458_v2 }
 0x100   :  { %1391 = vmatpush3.msra.mxu1 %v956_v35 }
 0x101   :  { %1392 = vmatprep.subr.mxu1 %v1458_v2 }
 0x102   :  { %1393 = vmatpush3.msra.mxu1 %v955_v42 }
 0x103   :  { %1394 = vmatprep.subr.mxu1 %v1458_v2 }
 0x104   :  { %1395 = vmatpush3.msra.mxu1 %v954_v43 }
 0x105   :  { %1396 = vmatprep.subr.mxu1 %v1458_v2 }
 0x106   :  { %1397 = vmatpush3.msra.mxu1 %v953_v44 }
 0x107   :  { %1420 = vmatprep.subr.mxu1 %v1458_v2 }
 0x1b7   :  { %v854_v36 = vpop.f32.mrf.mxu1 }
 0x1b8   :  { %v855_v38 = vadd.f32 %v854_v36, %v781_v25 }
 0x1b9   :  { %v1370_v39 = vpop.f32.mrf.mxu1 }
 0x1ba   :  { %v865_v40 = vadd.f32 %v1266_v37, %v855_v38 }
 0x1bc   :  { %v866_v41 = vmax.f32 %v865_v40, 0.0 }
 0x1be   :  { %1380 = vmatmul.mubr.msk.f32.vlgmr.msra.gmra.mxu0 %vm878_vm12, %v866_v41 }
 0x1bf   :  { %1417 = vmatprep.mubr.msk.f32.mxu0 %vm1460_vm2, %v1458_v2  ;;  %1402 = vmatpush3.msra.mxu0 %v1050_v45 }
 0x1c0   :  { %1403 = vmatprep.subr.mxu0 %v1458_v2 }
 0x1c1   :  { %1404 = vmatpush3.msra.mxu0 %v1049_v46 }
 0x1c2   :  { %1405 = vmatprep.subr.mxu0 %v1458_v2 }
 0x1c3   :  { %1406 = vmatpush3.msra.mxu0 %v1048_v47 }
 0x1c4   :  { %1407 = vmatprep.subr.mxu0 %v1458_v2 }
 0x1c5   :  { %1408 = vmatpush3.msra.mxu0 %v1047_v48 }
 0x1c6   :  { %1409 = vmatprep.subr.mxu0 %v1458_v2 }
 0x1c7   :  { %1410 = vmatpush3.msra.mxu0 %v1046_v49 }
 0x1c8   :  { %1411 = vmatprep.subr.mxu0 %v1458_v2 }
 0x1c9   :  { %1412 = vmatpush3.msra.mxu0 %v1045_v55 }
 0x1ca   :  { %1413 = vmatprep.subr.mxu0 %v1458_v2 }
 0x1cb   :  { %1414 = vmatpush3.msra.mxu0 %v1044_v56 }
 0x1cc   :  { %1415 = vmatprep.subr.mxu0 %v1458_v2 }
 0x1cd   :  { %1416 = vmatpush3.msra.mxu0 %v1043_v57 }
 0x27e   :  { %v948_v51 = vpop.f32.mrf.mxu0 }
 0x27f   :  { %v949_v52 = vadd.f32 %v1267_v50, %v948_v51 }
 0x280   :  { %v1381_v53 = vpop.f32.mrf.mxu0 }
 0x281   :  { %v952_v54 = vmax.f32 %v949_v52, 0.0 }
 0x283   :  { %1399 = vmatmul.mubr.msk.f32.vlgmr.msra.gmra.mxu1 %vm968_vm13, %v952_v54 }
 0x284   :  { %1428 = vmatprep.mubr.msk.f32.mxu1 %vm1460_vm2, %v1458_v2  ;;  %1421 = vmatpush3.msra.mxu1 %v1135_v58 }
 0x285   :  { %1422 = vmatprep.subr.mxu1 %v1458_v2 }
 0x286   :  { %1423 = vmatpush3.msra.mxu1 %v1134_v0 }
 0x287   :  { %1424 = vmatprep.subr.mxu1 %v1458_v2 }
 0x288   :  { %1425 = vmatpush3.msra.mxu1 %v1133_v1 }
 0x289   :  { %1426 = vmatprep.subr.mxu1 %v1458_v2 }
 0x28a   :  { %1427 = vmatpush3.msra.mxu1 %v1132_v4 }
 0x343   :  { %v1038_v60 = vpop.f32.mrf.mxu1 }
 0x344   :  { %v1039_v61 = vadd.f32 %v1269_v59, %v1038_v60 }
 0x345   :  { %v1400_v62 = vpop.f32.mrf.mxu1 }
 0x346   :  { %v1042_v63 = vmax.f32 %v1039_v61, 0.0 }
 0x348   :  { %1418 = vmatmul.mubr.msk.f32.vlgmr.msra.gmra.mxu0 %vm968_vm13, %v1042_v63 }
 0x408   :  { %v1127_v6 = vpop.f32.mrf.mxu0 }
 0x409   :  { %v1128_v7 = vadd.f32 %v1271_v5, %v1127_v6 }
 0x40a   :  { %v1419_v8 = vpop.f32.mrf.mxu0 }
 0x40b   :  { %v1131_v3 = vmax.f32 %v1128_v7, 0.0 }
 0x40d   :  { %1429 = vmatmul.mubr.msk.f32.vlgmr.msra.gmra.mxu1 %vm878_vm12, %v1131_v3 }
 0x4cd   :  { %v1212_v2 = vpop.f32.mrf.mxu1 }
 0x4ce   :  { %v1213_v10 = vadd.f32 %v1273_v9, %v1212_v2 }
 0x4cf   :  { %v1430_v11 = vpop.f32.mrf.mxu1 }
 0x4d0   :  { %1216 = vst [vmem:[#allocation4] sm:$0xff] %v1213_v10 }
 0x4d1   :  { %1447 = shalt.err (!%p1444_p4)
}
 0x4d2   :  { %1226 = dma.vmem_to_hbm [thread:$0]  %s1224_s8, 128, %s1964_s14, [#allocation5]  }
 0x4d3   :  { %1456 = dma.done.wait [#allocation5], 128  }
 0x4d4   :  { %1457 = vsyncadd [#allocation5], 4294967168 }
 0x4d5   :  { %1230 = vsyncpa [#allocation5], 1 }

</bundles_post_ra>
